<compile_context>
chip_gen: v7x
topology: tpu7x:2x2x1
jax: 0.10.0
libtpu: 0.0.40
codegen_flags: <defaults>
</compile_context>

<pallas_src>
import functools

import jax
import jax.numpy as jnp
from jax.experimental import pallas as pl
from jax.experimental.pallas import tpu as pltpu

# Finite sentinel (NOT -inf): it flows through 0 * m in the node_m gather matmul and
# through (m - m) in the cross-split merge; -inf would produce NaNs.
_NEG = float(jnp.finfo(jnp.float32).min)


def _round_up(v, m):
    return ((v + m - 1) // m) * m


def _row_to_col(v):
    """[1, K] -> [K, 1] via iota + select + lane reduction (no relayout primitive).

    O(K^2) VPU work per tile; negligible for K <= 64 graphs (the common pooling case).
    For hundreds of graphs an XLU transpose / windowed-mask restructure is the right
    move instead (see TODO above).
    """
    k = v.shape[1]
    r = jax.lax.broadcasted_iota(jnp.int32, (k, k), 0)
    c = jax.lax.broadcasted_iota(jnp.int32, (k, k), 1)
    return jnp.sum(jnp.where(r == c, v, 0.0), axis=1, keepdims=True)


def _global_attn_kernel(x_ref, w_ref, b_ref, batch_row_ref, batch_col_ref,
                        acc_ref, m_ref, s_ref, *, scatter_dtype):
    t = pl.program_id(1)                  # position along the reduction (node-tile) axis
    tile_n = x_ref.shape[0]
    n_graphs, hp = acc_ref.shape          # padded graph count (x8), padded hidden (x128)

    @pl.when(t == 0)
    def _init():
        acc_ref[...] = jnp.zeros_like(acc_ref)
        s_ref[...] = jnp.zeros_like(s_ref)
        m_ref[...] = jnp.full_like(m_ref, _NEG)

    x = x_ref[...]                                       # [TN, Hp]
    w = w_ref[...]                                       # [1, Hp] f32
    bias = b_ref[0, 0]                                   # SMEM scalar
    batch_row = batch_row_ref[...]                       # [1, TN] int32 (nodes on lanes)
    batch_col = batch_col_ref[...]                       # [TN, 1] int32 (nodes on sublanes)

    # gate_nn(x) on the VPU: elementwise multiply in x's dtype, f32 accumulation.
    gate = jnp.sum(x * w.astype(x.dtype), axis=1, keepdims=True,
                   dtype=jnp.float32) + bias             # [TN, 1]

    # Segment-membership masks in both orientations, built from iota (no transposes).
    g_rows = jax.lax.broadcasted_iota(jnp.int32, (n_graphs, tile_n), 0)
    mask_bn = (g_rows == batch_row).astype(scatter_dtype)    # [Bp, TN], cast ONCE
    g_cols = jax.lax.broadcasted_iota(jnp.int32, (tile_n, n_graphs), 1)
    mask_nb = g_cols == batch_col                            # [TN, Bp] bool

    # Per-graph max of this tile (sublane reduce), converted to a column.
    masked_gate = jnp.where(mask_nb, gate, _NEG)             # [TN, Bp]
    tile_max = _row_to_col(jnp.max(masked_gate, axis=0, keepdims=True))   # [Bp, 1]

    m_old = m_ref[...]
    m_new = jnp.maximum(m_old, tile_max)                     # [Bp, 1]
    corr = jnp.exp(m_old - m_new)                            # [Bp, 1], <= 1

    # Gather the running max back to nodes: node_m[n] = m_new[batch[n]].
    node_m = jnp.dot(mask_nb.astype(jnp.float32), m_new,
                     preferred_element_type=jnp.float32)     # [TN, 1]
    e = jnp.exp(gate - node_m)                               # [TN, 1], <= 1 for valid nodes

    # One fused MXU matmul per tile: scatter-add of e*x over graphs AND the per-graph
    # sum of exponentials (e packed into lane 0 of an extra 128-lane block of the RHS).
    ex = (e.astype(x.dtype) * x).astype(scatter_dtype)       # [TN, Hp]
    lane = jax.lax.broadcasted_iota(jnp.int32, (tile_n, 128), 1)
    e_blk = jnp.where(lane == 0, e, 0.0).astype(scatter_dtype)   # [TN, 128]
    rhs = jnp.concatenate([ex, e_blk], axis=1)               # [TN, Hp + 128]
    res = jnp.dot(mask_bn, rhs, preferred_element_type=jnp.float32)   # [Bp, Hp + 128]

    s_ref[...] = corr * s_ref[...] + jnp.sum(res[:, hp:], axis=1, keepdims=True)
    acc_ref[...] = corr * acc_ref[...] + res[:, :hp]         # accumulate in the output block
    m_ref[...] = m_new


def global_attention_pool(x, batch, weight, bias, num_graphs, *, tile_n=1024,
                          num_splits=2, scatter_dtype=jnp.bfloat16):
    """x: [N, H], batch: [N] int32, weight: [1, H] or [H], bias: [1] -> [num_graphs, H] f32.

    scatter_dtype: MXU operand dtype for the membership-mask scatter matmul. The 0/1
    mask is exact in bf16 and accumulation is f32; pass jnp.float32 for bit-tighter
    numerics at ~3x the MXU passes.
    """
    N, H = x.shape
    B = int(num_graphs)
    num_splits = max(int(num_splits), 1)

    Hp = _round_up(H, 128)                 # lane-dense feature axis
    Bp = _round_up(max(B, 1), 8)           # sublane-aligned graph axis
    scat_bytes = jnp.dtype(scatter_dtype).itemsize

    # --- tile size & VMEM budget (per-generation ceiling) -----------------------------
    TN = _round_up(min(int(tile_n), _round_up(N, 128)), 128)

    def _vmem_need(tn):
        dbuf = 2 * (tn * Hp * x.dtype.itemsize          # x tile (double-buffered)
                    + tn * 128 * 4 + 8 * tn * 4)        # batch_col / batch_row blocks
        resident = 2 * (Bp * Hp * 4 + 2 * Bp * 4) + 8 * Hp * 4   # out/m/s (+w) blocks
        temps = (tn * (Hp + 128) * (x.dtype.itemsize + scat_bytes)   # ex / rhs
                 + 2 * Bp * tn * 4                                   # masks / masked gate
                 + Bp * (Hp + 128) * 4)                              # matmul result
        return dbuf + resident + temps + (4 << 20)

    ceiling = 48 * 1024 * 1024             # safe on v7x (64 MiB VMEM per TensorCore)
    try:                                   # use the real capacity when queryable
        cap = int(pltpu.get_tpu_info().vmem_capacity_bytes)
        ceiling = min(cap * 3 // 4, 96 * 1024 * 1024)   # ~96 MiB on v5e/v6e, ~48 MiB on v7x
    except Exception:
        pass
    while TN > 128 and _vmem_need(TN) > ceiling:
        TN = max(128, _round_up(TN // 2, 128))
    vmem_limit = int(min(max(_vmem_need(TN), 32 * 1024 * 1024), ceiling))

    tiles_total = max((N + TN - 1) // TN, 1)
    tiles_per_split = (tiles_total + num_splits - 1) // num_splits
    Np = num_splits * tiles_per_split * TN

    # --- padded operands ----------------------------------------------------------------
    x_p = jnp.zeros((Np, Hp), x.dtype).at[:N, :H].set(x)
    w_row = jnp.zeros((1, Hp), jnp.float32).at[0, :H].set(
        jnp.asarray(weight, jnp.float32).reshape(-1))
    b2 = jnp.asarray(bias, jnp.float32).reshape(1, 1)
    batch_p = jnp.full((Np,), Bp, jnp.int32).at[:N].set(    # pad id matches no graph row
        jnp.asarray(batch, jnp.int32).reshape(-1))
    batch_row = batch_p.reshape(1, Np)
    batch_col = batch_p.reshape(Np, 1)

    cost = pl.CostEstimate(
        flops=2 * Np * (Hp + 128) * Bp + 2 * Np * Bp + 2 * Np * Hp,
        transcendentals=Np + 2 * Bp * num_splits * tiles_per_split,
        bytes_accessed=(Np * Hp * x.dtype.itemsize + 8 * Np
                        + 4 * num_splits * Bp * (Hp + 2) + 4 * (Hp + 1)))

    kernel = functools.partial(_global_attn_kernel, scatter_dtype=scatter_dtype)
    acc_p, m_p, s_p = pl.pallas_call(
        kernel,
        out_shape=(
            jax.ShapeDtypeStruct((num_splits, Bp, Hp), jnp.float32),   # un-normalized sums
            jax.ShapeDtypeStruct((num_splits, Bp, 1), jnp.float32),    # running max
            jax.ShapeDtypeStruct((num_splits, Bp, 1), jnp.float32),    # running sum(exp)
        ),
        grid=(num_splits, tiles_per_split),
        in_specs=[
            pl.BlockSpec((TN, Hp), lambda c, t: (c * tiles_per_split + t, 0)),  # x tiles
            pl.BlockSpec((1, Hp), lambda c, t: (0, 0)),                         # gate weight
            pl.BlockSpec(memory_space=pltpu.MemorySpace.SMEM),                  # gate bias
            pl.BlockSpec((1, TN), lambda c, t: (0, c * tiles_per_split + t)),   # batch (lanes)
            pl.BlockSpec((TN, 1), lambda c, t: (c * tiles_per_split + t, 0)),   # batch (sublanes)
        ],
        out_specs=(
            pl.BlockSpec((None, Bp, Hp), lambda c, t: (c, 0, 0)),   # resident over t
            pl.BlockSpec((None, Bp, 1), lambda c, t: (c, 0, 0)),
            pl.BlockSpec((None, Bp, 1), lambda c, t: (c, 0, 0)),
        ),
        compiler_params=pltpu.CompilerParams(
            dimension_semantics=("parallel", "arbitrary"),
            vmem_limit_bytes=vmem_limit),
        cost_estimate=cost,
    )(x_p, w_row, b2, batch_row, batch_col)

    # --- tiny XLA epilogue: merge per-split online-softmax states, then normalize -------
    m = jnp.max(m_p, axis=0)                        # [Bp, 1]
    scale = jnp.exp(m_p - m[None])                  # [S, Bp, 1]
    s = jnp.sum(scale * s_p, axis=0)                # [Bp, 1]
    acc = jnp.sum(scale * acc_p, axis=0)            # [Bp, Hp]
    out = acc / (s + 1e-16)                         # torch_geometric softmax epsilon
    return out[:B, :H]


def _reference(x, batch, weight, bias, num_graphs):
    gate = x @ weight.reshape(-1, 1) + bias.reshape(1, 1)              # [N, 1]
    seg_max = jax.ops.segment_max(gate[:, 0], batch, num_segments=num_graphs)
    e = jnp.exp(gate[:, 0] - seg_max[batch])
    seg_sum = jax.ops.segment_sum(e, batch, num_segments=num_graphs)
    alpha = e / (seg_sum[batch] + 1e-16)
    return jax.ops.segment_sum(alpha[:, None] * x, batch, num_segments=num_graphs)


if __name__ == "__main__":
    hidden = 32
    N = 8            # number of nodes
    num_graphs = 2

    key = jax.random.PRNGKey(0)
    kx, kw, kb = jax.random.split(key, 3)

    x = jax.random.normal(kx, (N, hidden), dtype=jnp.float32)
    batch = jnp.array([0, 0, 0, 1, 1, 1, 1, 1], dtype=jnp.int32)

    # Deterministic Linear(hidden, 1) init (uniform(-1/sqrt(H), 1/sqrt(H)), torch default)
    bound = 1.0 / (hidden ** 0.5)
    weight = jax.random.uniform(kw, (1, hidden), minval=-bound, maxval=bound,
                                dtype=jnp.float32)
    bias = jax.random.uniform(kb, (1,), minval=-bound, maxval=bound,
                              dtype=jnp.float32)

    ref = _reference(x, batch, weight, bias, num_graphs)

    # Exact-precision scatter path.
    out_f32 = global_attention_pool(x, batch, weight, bias, num_graphs,
                                    scatter_dtype=jnp.float32)
    out_f32 = jax.block_until_ready(out_f32)
    assert out_f32.shape == (num_graphs, hidden)
    assert jnp.allclose(out_f32, ref, atol=1e-4, rtol=1e-4), "f32 path mismatch vs reference"

    # Default (bf16 MXU scatter) path.
    out_bf = global_attention_pool(x, batch, weight, bias, num_graphs)
    out_bf = jax.block_until_ready(out_bf)
    assert out_bf.shape == (num_graphs, hidden)
    assert jnp.allclose(out_bf, ref, atol=2e-2, rtol=2e-2), "bf16 path mismatch vs reference"

    print("KERNEL_OK")
</pallas_src>

<mosaic_0001>
module attributes {stable_mosaic.version = 11 : i64} {
  func.func @_global_attn_kernel(%arg0: i32, %arg1: i32, %arg2: memref<128x128xf32, #tpu.memory_space<vmem>>, %arg3: memref<1x128xf32, #tpu.memory_space<vmem>>, %arg4: memref<1x1xf32, #tpu.memory_space<smem>>, %arg5: memref<1x128xi32, #tpu.memory_space<vmem>>, %arg6: memref<128x1xi32, #tpu.memory_space<vmem>>, %arg7: memref<1x8x128xf32, #tpu.memory_space<vmem>>, %arg8: memref<1x8x1xf32, #tpu.memory_space<vmem>>, %arg9: memref<1x8x1xf32, #tpu.memory_space<vmem>>) attributes {dimension_semantics = [#tpu.dimension_semantics<parallel>, #tpu.dimension_semantics<arbitrary>], iteration_bounds = array<i64: 2, 1>, scalar_prefetch = 0 : i64, scratch_operands = 0 : i64, tpu.core_type = #tpu.core_type<tc>, window_params = [{transform_indices = @transform_0, window_bounds = array<i64: 128, 128>}, {pipeline_mode = #tpu.pipeline_mode<synchronous>, transform_indices = @transform_1, window_bounds = array<i64: 1, 128>}, {transform_indices = @transform_2, window_bounds = array<i64: 1, 1>}, {transform_indices = @transform_3, window_bounds = array<i64: 1, 128>}, {transform_indices = @transform_4, window_bounds = array<i64: 128, 1>}, {transform_indices = @transform_5, window_bounds = array<i64: 1, 8, 128>}, {transform_indices = @transform_6, window_bounds = array<i64: 1, 8, 1>}, {transform_indices = @transform_7, window_bounds = array<i64: 1, 8, 1>}]} {
    %c0_i32 = arith.constant 0 : i32
    %0 = arith.cmpi eq, %arg1, %c0_i32 : i32
    %1 = arith.extui %0 : i1 to i32
    %c0_i32_0 = arith.constant 0 : i32
    %2 = arith.cmpi ne, %1, %c0_i32_0 : i32
    scf.if %2 {
      %cst_37 = arith.constant 0.000000e+00 : f32
      %80 = vector.broadcast %cst_37 : f32 to vector<8x128xf32>
      %c0_38 = arith.constant 0 : index
      %c0_39 = arith.constant 0 : index
      %c0_40 = arith.constant 0 : index
      %81 = vector.load %arg7[%c0_38, %c0_39, %c0_40] : memref<1x8x128xf32, #tpu.memory_space<vmem>>, vector<1x8x128xf32>
      %82 = vector.shape_cast %81 : vector<1x8x128xf32> to vector<8x128xf32>
      %83 = vector.shape_cast %80 : vector<8x128xf32> to vector<1x8x128xf32>
      tpu.vector_store %arg7[%c0_38, %c0_39, %c0_40], %83 {strides = array<i32>} : memref<1x8x128xf32, #tpu.memory_space<vmem>>, vector<1x8x128xf32>,
      %cst_41 = arith.constant 0.000000e+00 : f32
      %84 = vector.broadcast %cst_41 : f32 to vector<8x1xf32>
      %c0_42 = arith.constant 0 : index
      %c0_43 = arith.constant 0 : index
      %c0_44 = arith.constant 0 : index
      %85 = vector.load %arg9[%c0_42, %c0_43, %c0_44] : memref<1x8x1xf32, #tpu.memory_space<vmem>>, vector<1x8x1xf32>
      %86 = vector.shape_cast %85 : vector<1x8x1xf32> to vector<8x1xf32>
      %87 = vector.shape_cast %84 : vector<8x1xf32> to vector<1x8x1xf32>
      tpu.vector_store %arg9[%c0_42, %c0_43, %c0_44], %87 {strides = array<i32>} : memref<1x8x1xf32, #tpu.memory_space<vmem>>, vector<1x8x1xf32>,
      %cst_45 = arith.constant -3.40282347E+38 : f32
      %88 = vector.broadcast %cst_45 : f32 to vector<8x1xf32>
      %c0_46 = arith.constant 0 : index
      %c0_47 = arith.constant 0 : index
      %c0_48 = arith.constant 0 : index
      %89 = vector.load %arg8[%c0_46, %c0_47, %c0_48] : memref<1x8x1xf32, #tpu.memory_space<vmem>>, vector<1x8x1xf32>
      %90 = vector.shape_cast %89 : vector<1x8x1xf32> to vector<8x1xf32>
      %91 = vector.shape_cast %88 : vector<8x1xf32> to vector<1x8x1xf32>
      tpu.vector_store %arg8[%c0_46, %c0_47, %c0_48], %91 {strides = array<i32>} : memref<1x8x1xf32, #tpu.memory_space<vmem>>, vector<1x8x1xf32>,
    } else {
    }
    %c0 = arith.constant 0 : index
    %c0_1 = arith.constant 0 : index
    %3 = vector.load %arg2[%c0, %c0_1] : memref<128x128xf32, #tpu.memory_space<vmem>>, vector<128x128xf32>
    %c0_2 = arith.constant 0 : index
    %c0_3 = arith.constant 0 : index
    %4 = vector.load %arg3[%c0_2, %c0_3] : memref<1x128xf32, #tpu.memory_space<vmem>>, vector<1x128xf32>
    %c0_4 = arith.constant 0 : index
    %c0_5 = arith.constant 0 : index
    %5 = memref.load %arg4[%c0_4, %c0_5] : memref<1x1xf32, #tpu.memory_space<smem>>
    %c0_6 = arith.constant 0 : index
    %c0_7 = arith.constant 0 : index
    %6 = vector.load %arg5[%c0_6, %c0_7] : memref<1x128xi32, #tpu.memory_space<vmem>>, vector<1x128xi32>
    %c0_8 = arith.constant 0 : index
    %c0_9 = arith.constant 0 : index
    %7 = vector.load %arg6[%c0_8, %c0_9] : memref<128x1xi32, #tpu.memory_space<vmem>>, vector<128x1xi32>
    %8 = vector.broadcast %4 : vector<1x128xf32> to vector<128x128xf32>
    %9 = arith.mulf %3, %8 : vector<128x128xf32>
    %cst = arith.constant dense<0.000000e+00> : vector<128xf32>
    %10 = vector.multi_reduction <add>, %9, %cst [1] : vector<128x128xf32> to vector<128xf32>
    %11 = vector.shape_cast %10 : vector<128xf32> to vector<128x1xf32>
    %12 = vector.broadcast %5 : f32 to vector<128x1xf32>
    %13 = arith.addf %11, %12 : vector<128x1xf32>
    %14 = tpu.iota {dimensions = array<i32: 0>} : vector<8x128xi32>
    %15 = vector.broadcast %6 : vector<1x128xi32> to vector<8x128xi32>
    %16 = arith.cmpi eq, %14, %15 : vector<8x128xi32>
    %17 = arith.extui %16 : vector<8x128xi1> to vector<8x128xi32>
    %18 = arith.sitofp %17 : vector<8x128xi32> to vector<8x128xf32>
    %19 = tpu.iota {dimensions = array<i32: 1>} : vector<128x8xi32>
    %20 = vector.broadcast %7 : vector<128x1xi32> to vector<128x8xi32>
    %21 = arith.cmpi eq, %19, %20 : vector<128x8xi32>
    %cst_10 = arith.constant -3.40282347E+38 : f32
    %22 = vector.shape_cast %13 : vector<128x1xf32> to vector<128x1xf32>
    %23 = vector.broadcast %22 : vector<128x1xf32> to vector<128x8xf32>
    %24 = vector.broadcast %cst_10 : f32 to vector<128x8xf32>
    %25 = arith.select %21, %23, %24 : vector<128x8xi1>, vector<128x8xf32>
    %cst_11 = arith.constant dense<0xFF800000> : vector<8xf32>
    %26 = vector.multi_reduction <maximumf>, %25, %cst_11 [0] : vector<128x8xf32> to vector<8xf32>
    %27 = vector.shape_cast %26 : vector<8xf32> to vector<1x8xf32>
    %28 = tpu.iota {dimensions = array<i32: 0>} : vector<8x8xi32>
    %29 = tpu.iota {dimensions = array<i32: 1>} : vector<8x8xi32>
    %30 = arith.cmpi eq, %28, %29 : vector<8x8xi32>
    %cst_12 = arith.constant 0.000000e+00 : f32
    %31 = vector.shape_cast %27 : vector<1x8xf32> to vector<1x8xf32>
    %32 = vector.broadcast %31 : vector<1x8xf32> to vector<8x8xf32>
    %33 = vector.broadcast %cst_12 : f32 to vector<8x8xf32>
    %34 = arith.select %30, %32, %33 : vector<8x8xi1>, vector<8x8xf32>
    %cst_13 = arith.constant dense<0.000000e+00> : vector<8xf32>
    %35 = vector.multi_reduction <add>, %34, %cst_13 [1] : vector<8x8xf32> to vector<8xf32>
    %36 = vector.shape_cast %35 : vector<8xf32> to vector<8x1xf32>
    %c0_14 = arith.constant 0 : index
    %c0_15 = arith.constant 0 : index
    %c0_16 = arith.constant 0 : index
    %37 = vector.load %arg8[%c0_14, %c0_15, %c0_16] : memref<1x8x1xf32, #tpu.memory_space<vmem>>, vector<1x8x1xf32>
    %38 = vector.shape_cast %37 : vector<1x8x1xf32> to vector<8x1xf32>
    %39 = arith.maximumf %38, %36 : vector<8x1xf32>
    %40 = arith.subf %38, %39 : vector<8x1xf32>
    %41 = math.exp %40 : vector<8x1xf32>
    %42 = arith.extui %21 : vector<128x8xi1> to vector<128x8xi32>
    %43 = arith.sitofp %42 : vector<128x8xi32> to vector<128x8xf32>
    %cst_17 = arith.constant dense<0.000000e+00> : vector<128x1xf32>
    %44 = tpu.matmul %43, %39, %cst_17 {dimension_numbers = #tpu.dot_dimension_numbers<[1], [0], [0], [1], [0, 0, 1, 1], [], []>} : vector<128x8xf32>, vector<8x1xf32>, vector<128x1xf32> -> vector<128x1xf32>
    %45 = arith.subf %13, %44 : vector<128x1xf32>
    %46 = math.exp %45 : vector<128x1xf32>
    %47 = vector.broadcast %46 : vector<128x1xf32> to vector<128x128xf32>
    %48 = arith.mulf %47, %3 : vector<128x128xf32>
    %49 = tpu.iota {dimensions = array<i32: 1>} : vector<128x128xi32>
    %c0_i32_18 = arith.constant 0 : i32
    %50 = vector.broadcast %c0_i32_18 : i32 to vector<128x128xi32>
    %51 = arith.cmpi eq, %49, %50 : vector<128x128xi32>
    %cst_19 = arith.constant 0.000000e+00 : f32
    %52 = vector.shape_cast %46 : vector<128x1xf32> to vector<128x1xf32>
    %53 = vector.broadcast %52 : vector<128x1xf32> to vector<128x128xf32>
    %54 = vector.broadcast %cst_19 : f32 to vector<128x128xf32>
    %55 = arith.select %51, %53, %54 : vector<128x128xi1>, vector<128x128xf32>
    %56 = tpu.concatenate %48, %55 in 1 : vector<128x128xf32>, vector<128x128xf32> -> vector<128x256xf32>
    %cst_20 = arith.constant dense<0.000000e+00> : vector<8x256xf32>
    %57 = tpu.matmul %18, %56, %cst_20 {dimension_numbers = #tpu.dot_dimension_numbers<[1], [0], [0], [1], [0, 0, 1, 1], [], []>} : vector<8x128xf32>, vector<128x256xf32>, vector<8x256xf32> -> vector<8x256xf32>
    %c0_21 = arith.constant 0 : index
    %c0_22 = arith.constant 0 : index
    %c0_23 = arith.constant 0 : index
    %58 = vector.load %arg9[%c0_21, %c0_22, %c0_23] : memref<1x8x1xf32, #tpu.memory_space<vmem>>, vector<1x8x1xf32>
    %59 = vector.shape_cast %58 : vector<1x8x1xf32> to vector<8x1xf32>
    %60 = arith.mulf %41, %59 : vector<8x1xf32>
    %61 = vector.extract_strided_slice %57 {offsets = [0, 128], sizes = [8, 128], strides = [1, 1]} : vector<8x256xf32> to vector<8x128xf32>
    %cst_24 = arith.constant dense<0.000000e+00> : vector<8xf32>
    %62 = vector.multi_reduction <add>, %61, %cst_24 [1] : vector<8x128xf32> to vector<8xf32>
    %63 = vector.shape_cast %62 : vector<8xf32> to vector<8x1xf32>
    %64 = arith.addf %60, %63 : vector<8x1xf32>
    %c0_25 = arith.constant 0 : index
    %c0_26 = arith.constant 0 : index
    %c0_27 = arith.constant 0 : index
    %65 = vector.load %arg9[%c0_25, %c0_26, %c0_27] : memref<1x8x1xf32, #tpu.memory_space<vmem>>, vector<1x8x1xf32>
    %66 = vector.shape_cast %65 : vector<1x8x1xf32> to vector<8x1xf32>
    %67 = vector.shape_cast %64 : vector<8x1xf32> to vector<1x8x1xf32>
    tpu.vector_store %arg9[%c0_25, %c0_26, %c0_27], %67 {strides = array<i32>} : memref<1x8x1xf32, #tpu.memory_space<vmem>>, vector<1x8x1xf32>,
    %c0_28 = arith.constant 0 : index
    %c0_29 = arith.constant 0 : index
    %c0_30 = arith.constant 0 : index
    %68 = vector.load %arg7[%c0_28, %c0_29, %c0_30] : memref<1x8x128xf32, #tpu.memory_space<vmem>>, vector<1x8x128xf32>
    %69 = vector.shape_cast %68 : vector<1x8x128xf32> to vector<8x128xf32>
    %70 = vector.broadcast %41 : vector<8x1xf32> to vector<8x128xf32>
    %71 = arith.mulf %70, %69 : vector<8x128xf32>
    %72 = vector.extract_strided_slice %57 {offsets = [0, 0], sizes = [8, 128], strides = [1, 1]} : vector<8x256xf32> to vector<8x128xf32>
    %73 = arith.addf %71, %72 : vector<8x128xf32>
    %c0_31 = arith.constant 0 : index
    %c0_32 = arith.constant 0 : index
    %c0_33 = arith.constant 0 : index
    %74 = vector.load %arg7[%c0_31, %c0_32, %c0_33] : memref<1x8x128xf32, #tpu.memory_space<vmem>>, vector<1x8x128xf32>
    %75 = vector.shape_cast %74 : vector<1x8x128xf32> to vector<8x128xf32>
    %76 = vector.shape_cast %73 : vector<8x128xf32> to vector<1x8x128xf32>
    tpu.vector_store %arg7[%c0_31, %c0_32, %c0_33], %76 {strides = array<i32>} : memref<1x8x128xf32, #tpu.memory_space<vmem>>, vector<1x8x128xf32>,
    %c0_34 = arith.constant 0 : index
    %c0_35 = arith.constant 0 : index
    %c0_36 = arith.constant 0 : index
    %77 = vector.load %arg8[%c0_34, %c0_35, %c0_36] : memref<1x8x1xf32, #tpu.memory_space<vmem>>, vector<1x8x1xf32>
    %78 = vector.shape_cast %77 : vector<1x8x1xf32> to vector<8x1xf32>
    %79 = vector.shape_cast %39 : vector<8x1xf32> to vector<1x8x1xf32>
    tpu.vector_store %arg8[%c0_34, %c0_35, %c0_36], %79 {strides = array<i32>} : memref<1x8x1xf32, #tpu.memory_space<vmem>>, vector<1x8x1xf32>,
    return
  }
  func.func @transform_0(%arg0: i32, %arg1: i32) -> (i32, i32) {
    %c1_i32 = arith.constant 1 : i32
    %0 = arith.muli %arg0, %c1_i32 : i32
    %1 = arith.addi %0, %arg1 : i32
    %c0_i32 = arith.constant 0 : i32
    %c0_i32_0 = arith.constant 0 : i32
    return %1, %c0_i32 : i32, i32
  }
  func.func @transform_1(%arg0: i32, %arg1: i32) -> (i32, i32) {
    %c0_i32 = arith.constant 0 : i32
    %c0_i32_0 = arith.constant 0 : i32
    %c0_i32_1 = arith.constant 0 : i32
    return %c0_i32, %c0_i32_0 : i32, i32
  }
  func.func @transform_2(%arg0: i32, %arg1: i32) -> (i32, i32) {
    %c0_i32 = arith.constant 0 : i32
    %c0_i32_0 = arith.constant 0 : i32
    %c0_i32_1 = arith.constant 0 : i32
    return %c0_i32, %c0_i32_0 : i32, i32
  }
  func.func @transform_3(%arg0: i32, %arg1: i32) -> (i32, i32) {
    %c1_i32 = arith.constant 1 : i32
    %0 = arith.muli %arg0, %c1_i32 : i32
    %1 = arith.addi %0, %arg1 : i32
    %c0_i32 = arith.constant 0 : i32
    %c0_i32_0 = arith.constant 0 : i32
    return %c0_i32, %1 : i32, i32
  }
  func.func @transform_4(%arg0: i32, %arg1: i32) -> (i32, i32) {
    %c1_i32 = arith.constant 1 : i32
    %0 = arith.muli %arg0, %c1_i32 : i32
    %1 = arith.addi %0, %arg1 : i32
    %c0_i32 = arith.constant 0 : i32
    %c0_i32_0 = arith.constant 0 : i32
    return %1, %c0_i32 : i32, i32
  }
  func.func @transform_5(%arg0: i32, %arg1: i32) -> (i32, i32, i32) {
    %c0_i32 = arith.constant 0 : i32
    %c0_i32_0 = arith.constant 0 : i32
    %c0_i32_1 = arith.constant 0 : i32
    return %arg0, %c0_i32, %c0_i32_0 : i32, i32, i32
  }
  func.func @transform_6(%arg0: i32, %arg1: i32) -> (i32, i32, i32) {
    %c0_i32 = arith.constant 0 : i32
    %c0_i32_0 = arith.constant 0 : i32
    %c0_i32_1 = arith.constant 0 : i32
    return %arg0, %c0_i32, %c0_i32_0 : i32, i32, i32
  }
  func.func @transform_7(%arg0: i32, %arg1: i32) -> (i32, i32, i32) {
    %c0_i32 = arith.constant 0 : i32
    %c0_i32_0 = arith.constant 0 : i32
    %c0_i32_1 = arith.constant 0 : i32
    return %arg0, %c0_i32, %c0_i32_0 : i32, i32, i32
  }
}

</mosaic_0001>

<bundles_post_ra>
// kernel: tpu_custom_call.1
= control target key start
LH: loop header
LB: loop body
LE: loop exit
PB: predicated region body
PF: predicated region fallthrough
CT: control target
= control target key end

     0   :  { %s2198_s0 = inlined_call_operand.vmem [shape: f32[256,128], index: 0, kind: input, shape index: {}]   ;;  %s2199_s1 = inlined_call_operand.vmem [shape: f32[1,128], index: 1, kind: input, shape index: {}]   ;;  %s2200_s2 = inlined_call_operand.<no memory space> [shape: f32[1,1], index: 2, kind: input, shape index: {}]   ;;  %s2201_s3 = inlined_call_operand.vmem [shape: s32[1,256], index: 3, kind: input, shape index: {}]   ;;  %s2202_s4 = inlined_call_operand.vmem [shape: s32[256,1], index: 4, kind: input, shape index: {}]   ;;  %s2203_s5 = inlined_call_operand.hbm [shape: f32[2,8,128], index: 5, kind: output, shape index: {0}]   ;;  %s2204_s6 = inlined_call_operand.vmem [shape: f32[2,8,1], index: 6, kind: output, shape index: {1}]   ;;  %s2205_s7 = inlined_call_operand.vmem [shape: f32[2,8,1], index: 7, kind: output, shape index: {2}]  }
   0x1   :  { %13 = sst [smem:[#allocation2]] %s2200_s2 }
   0x2   :  { %14 = vsyncpa [#allocation4], 0 }
   0x3   :  { %16 = vsyncpa [#allocation4 + $0x1], 0  ;;  %s1635_s26 = smov 0   ;;  %s1637_s27 = smov 0  }
   0x4   :  { %s1639_s28 = smov 0   ;;  %s1641_s29 = smov 0  }
   0x5   :  { %s1643_s30 = smov 0   ;;  %s1645_s8 = smov 0  }
   0x6 LB: > { %s1261_s2 = sadd.s32 4294967295, %s1585_s8   ;;  %s1262_s9 = sadd.s32 4294967294, %s1585_s8   ;;  %s1585_s8 = sphi %s1645_s8, %s22_s8   ;;  %s1581_s30 = sphi %s1643_s30, %s2241_s30   ;;  %s1577_s29 = sphi %s1641_s29, %s2240_s29   ;;  %s1573_s28 = sphi %s1639_s28, %s2239_s28   ;;  %s1569_s27 = sphi %s1637_s27, %s2238_s27   ;;  %s1565_s26 = sphi %s1635_s26, %s2237_s26  }
   0x7   : > { %s34_s10 = sadd.s32 1, %s1581_s30  ;;  %s167_s11 = sadd.s32 1, %s1573_s28 }
   0x8   : > { %p36_p0 = scmp.ge.s32.totalorder %s34_s10, 2  ;;  %p177_p1 = scmp.ne.s32.totalorder %s1573_s28, %s1569_s27 }
   0x9   : > { %p178_p2 = scmp.eq.s32.totalorder %s1261_s2, 1  ;;  %p183_p3 = scmp.ne.s32.totalorder %s1569_s27, %s1565_s26 }
   0xa   : > { %s2243_s10 = smov (%p36_p0, %s34_s10), 0  ;;  %p184_p5 = scmp.eq.s32.totalorder %s1262_s9, 1 }
   0xb   : > { %p1675_p4 = por %p178_p2, %p177_p1  ;;  %s164_s13 = ssub.s32 %s1581_s30, %s2243_s10 }
   0xc   : > { %p1265_p6 = scmp.ge.s32.totalorder %s1585_s8, 1  ;;  %p165_p7 = scmp.eq.s32.totalorder %s164_s13, 0 }
   0xd   : > { %p1682_p8 = por %p184_p5, %p183_p3  ;;  %p290_p9 = scmp.lt.s32.totalorder %s1585_s8, 3 }
   0xe   : > { %s1688_s15 = scalar_select %p165_p7, %s1573_s28, %s167_s11  }
   0xf   : > { %p291_p10 = pnand %p1265_p6, %p290_p9 }
  0x11   : > { %294 = sbr.rel (%p291_p10) target bundleno = 1188 (0x4a4), region = 40 }
  0x18   : > { %s1267_s16 = sshll.u32 %s1577_s29, 4  ;;  %v1587_v0 = vmov 0   ;;  %v1273_v1 = vld [vmem:[%s2199_s1] ss:$0 sm:$0xff]  ;;  %v2206_v35 = vmov 0.0   ;;  %p350_p12 = scmp.lt.s32.totalorder %s1577_s29, 1 }
  0x19   : > { %p343_p11 = scmp.lt.s32.totalorder %s1267_s16, 31  ;;  %1472 = vset.pattern.permute.xlu1 %v1587_v0  ;;  %1471 = vset.pattern.permute.xlu0 %v1587_v0  ;;  %vm375_vm0 = vcmask 7168   ;;  %v1589_v51 = vmov -3.4028235e+38   ;;  %vm575_vm2 = vcmask 64512   ;;  %s326_s24 = sand.u32 1, %s1569_s27  }
  0x1a   : > { %1073 = vmatprep.mubr.f32.mxu1 %v2206_v35  ;;  %s1794_s2 = scalar_select %p350_p12, %s1577_s29, 1 }
  0x1b   : > { %s2245_s16 = smov (!%p343_p11, %s1267_s16), 31  ;;  %s1098_s18 = scalar_lea.sflag [#allocation4], %s326_s24 }
  0x1c   : > { %s1268_s17 = sshll.u32 %s2245_s16, 3  ;;  %s1271_s9 = sshll.u32 %s1794_s2, 3 }
  0x1d   : > { %s1702_s22 = scalar_lea.vmem %s2198_s0, %s1268_s17  ;;  %s1773_s25 = scalar_lea.vmem %s2202_s4, %s1268_s17 }
  0x1e   : > { %v1705_v2 = vld [vmem:[%s1702_s22 + $0x10] sm:$0xff]  ;;  %v1708_v3 = vld [vmem:[%s1702_s22] sm:$0xff]  ;;  %v1711_v4 = vld [vmem:[%s1702_s22 + $0x18] sm:$0xff]  ;;  %s1802_s16 = scalar_lea.vmem %s2204_s6, %s1271_s9  ;;  %s395_s17 = sld [smem:[#allocation2]] }
  0x1f   : > { %v421_v5 = vmul.f32 %v1273_v1, %v1705_v2  ;;  %v419_v6 = vmul.f32 %v1273_v1, %v1708_v3  ;;  %v1716_v7 = vld [vmem:[%s1702_s22 + $0x8] sm:$0xff]  ;;  %v422_v8 = vmul.f32 %v1273_v1, %v1711_v4  ;;  %v1724_v11 = vld [vmem:[%s1702_s22 + $0x20] sm:$0xff]  ;;  %v1729_v14 = vld [vmem:[%s1702_s22 + $0x38] sm:$0xff]  ;;  %377 = vst.msk [vmem:[%s1802_s16] sm:$0xff] %vm375_vm0, %v1589_v51  ;;  %s1992_s20 = scalar_lea.vmem %s2205_s7, %s1271_s9  ;;  %s352_s23 = scalar_lea.vmem %s2201_s3, %s1794_s2 }
  0x20   : > { %v420_v9 = vmul.f32 %v1273_v1, %v1716_v7  ;;  %v1721_v10 = vld [vmem:[%s1702_s22 + $0x28] sm:$0xff]  ;;  %v423_v13 = vmul.f32 %v1273_v1, %v1724_v11  ;;  %v1732_v15 = vld [vmem:[%s1702_s22 + $0x30] sm:$0xff]  ;;  %v426_v16 = vmul.f32 %v1273_v1, %v1729_v14  ;;  %v1740_v19 = vld [vmem:[%s1702_s22 + $0x40] sm:$0xff]  ;;  %s1326_s9 = sshll.u32 %s1577_s29, 7  ;;  %s1591_s21 = smov [#allocation3]  }
  0x21   : > { %439 = vadd.xlane.f32.xlu1 %v421_v5  ;;  %435 = vadd.xlane.f32.xlu0 %v419_v6  ;;  %v424_v12 = vmul.f32 %v1273_v1, %v1721_v10  ;;  %v425_v17 = vmul.f32 %v1273_v1, %v1732_v15  ;;  %v1737_v18 = vld [vmem:[%s1702_s22 + $0x48] sm:$0xff]  ;;  %v427_v21 = vmul.f32 %v1273_v1, %v1740_v19  ;;  %v1745_v22 = vld [vmem:[%s1702_s22 + $0x58] sm:$0xff]  ;;  %v1748_v23 = vld [vmem:[%s1702_s22 + $0x50] sm:$0xff] }
  0x22   : > { %v428_v20 = vmul.f32 %v1273_v1, %v1737_v18  ;;  %2219 = vst [vmem:[#allocation6_spill] sm:$0xff] %v1745_v22  ;;  %2220 = vst [vmem:[#allocation7_spill] sm:$0xff] %v1748_v23  ;;  %v430_v24 = vmul.f32 %v1273_v1, %v1745_v22  ;;  %v429_v25 = vmul.f32 %v1273_v1, %v1748_v23  ;;  %v1753_v26 = vld [vmem:[%s1702_s22 + $0x68] sm:$0xff]  ;;  %v1756_v27 = vld [vmem:[%s1702_s22 + $0x60] sm:$0xff] }
  0x23   : > { %2221 = vst [vmem:[#allocation8_spill] sm:$0xff] %v1753_v26  ;;  %2222 = vst [vmem:[#allocation9_spill] sm:$0xff] %v1756_v27  ;;  %v432_v28 = vmul.f32 %v1273_v1, %v1753_v26  ;;  %v431_v29 = vmul.f32 %v1273_v1, %v1756_v27  ;;  %v1761_v30 = vld [vmem:[%s1702_s22 + $0x78] sm:$0xff]  ;;  %v1764_v31 = vld [vmem:[%s1702_s22 + $0x70] sm:$0xff]  ;;  %s1511_s22 = sshll.u32 %s1591_s21, 4  ;;  %s1512_s22 = int_to_ptr.vmem [resolvable:$false] %s1511_s22 }
  0x24   : > { %2223 = vst [vmem:[#allocation10_spill] sm:$0xff] %v1761_v30  ;;  %2224 = vst [vmem:[#allocation11_spill] sm:$0xff] %v1764_v31  ;;  %v434_v32 = vmul.f32 %v1273_v1, %v1761_v30  ;;  %v433_v33 = vmul.f32 %v1273_v1, %v1764_v31  ;;  %v398_v34 = vld [vmem:[%s1773_s25 + $0x8] sm:$0xff]  ;;  %v399_v36 = vld [vmem:[%s1773_s25 + $0x10] sm:$0xff] }
  0x25   : > { %441 = vadd.xlane.f32.xlu1 %v422_v8  ;;  %437 = vadd.xlane.f32.xlu0 %v420_v9  ;;  %v397_v37 = vld [vmem:[%s1773_s25] sm:$0xff]  ;;  %v400_v38 = vld [vmem:[%s1773_s25 + $0x18] sm:$0xff]  ;;  %v406_v39 = vld [vmem:[%s1773_s25 + $0x48] sm:$0xff]  ;;  %v2208_v8 = vlaneseq }
  0x26   : > { %v401_v40 = vld [vmem:[%s1773_s25 + $0x20] sm:$0xff]  ;;  %v408_v41 = vld [vmem:[%s1773_s25 + $0x58] sm:$0xff]  ;;  %v402_v42 = vld [vmem:[%s1773_s25 + $0x28] sm:$0xff] }
  0x27   : > { %v410_v43 = vld [vmem:[%s1773_s25 + $0x68] sm:$0xff]  ;;  %v403_v44 = vld [vmem:[%s1773_s25 + $0x30] sm:$0xff]  ;;  %v412_v45 = vld [vmem:[%s1773_s25 + $0x78] sm:$0xff] }
  0x28   : > { %v404_v46 = vld [vmem:[%s1773_s25 + $0x38] sm:$0xff]  ;;  %v405_v47 = vld [vmem:[%s1773_s25 + $0x40] sm:$0xff]  ;;  %v407_v48 = vld [vmem:[%s1773_s25 + $0x50] sm:$0xff] }
  0x29   : > { %445 = vadd.xlane.f32.xlu1 %v424_v12  ;;  %443 = vadd.xlane.f32.xlu0 %v423_v13  ;;  %v409_v49 = vld [vmem:[%s1773_s25 + $0x60] sm:$0xff]  ;;  %v411_v50 = vld [vmem:[%s1773_s25 + $0x70] sm:$0xff]  ;;  %v1809_v12 = vand.u32 127, %v2208_v8  ;;  %s1266_s25 = sshll.u32 %s326_s24, 3 }
  0x2a   : > { %s328_s2 = scalar_lea.vmem [#allocation3], %s1266_s25 }
  0x2b   : > { %s1119_s11 = sshll.u32 %s328_s2, 4  ;;  %s1120_s11 = int_to_ptr.vmem [resolvable:$true] %s1119_s11 }
  0x2c   : > { %s1507_s19 = scalar_lea.vmem %s1120_s11, 128  ;;  %p1514_p2 = scmp.lt.s32.totalorder %s1120_s11, %s1512_s22 }
  0x2d   : > { %449 = vadd.xlane.f32.xlu1 %v426_v16  ;;  %447 = vadd.xlane.f32.xlu0 %v425_v17  ;;  %p1508_p13 = scmp.ne.s32.totalorder %s1120_s11, %s1507_s19 }
  0x2f   : > { %p1509_p0 = pnand %p1508_p13, %p1675_p4 }
  0x31   : > { %453 = vadd.xlane.f32.xlu1 %v428_v20  ;;  %451 = vadd.xlane.f32.xlu0 %v427_v21  ;;  %p1510_p1 = pneg %p1509_p0 }
  0x35   : > { %457 = vadd.xlane.f32.xlu1 %v430_v24  ;;  %455 = vadd.xlane.f32.xlu0 %v429_v25 }
  0x39   : > { %461 = vadd.xlane.f32.xlu1 %v432_v28  ;;  %459 = vadd.xlane.f32.xlu0 %v431_v29  ;;  %v467_v29 = vstv %s395_s17  ;;  %s2153_s17 = scalar_lea.hbm %s2203_s5, %s1326_s9 }
  0x3d   : > { %465 = vadd.xlane.f32.xlu1 %v434_v32  ;;  %463 = vadd.xlane.f32.xlu0 %v433_v33 }
  0x4e   : > { %499 = vperm.xlu1 %1472, %v398_v34  }
  0x52   : > { %502 = vperm.xlu1 %1472, %v399_v36  }
  0x53   : > { %496 = vperm.xlu0 %1471, %v397_v37  }
  0x56   : > { %505 = vperm.xlu1 %1472, %v400_v38  }
  0x57   : > { %523 = vperm.xlu0 %1471, %v406_v39  }
  0x5a   : > { %508 = vperm.xlu1 %1472, %v401_v40  }
  0x5b   : > { %529 = vperm.xlu0 %1471, %v408_v41  }
  0x5e   : > { %511 = vperm.xlu1 %1472, %v402_v42  }
  0x5f   : > { %535 = vperm.xlu0 %1471, %v410_v43  }
  0x62   : > { %514 = vperm.xlu1 %1472, %v403_v44  }
  0x63   : > { %541 = vperm.xlu0 %1471, %v412_v45  }
  0x66   : > { %517 = vperm.xlu1 %1472, %v404_v46  }
  0x6a   : > { %520 = vperm.xlu1 %1472, %v405_v47  }
  0x6e   : > { %526 = vperm.xlu1 %1472, %v407_v48  }
  0x72   : > { %532 = vperm.xlu1 %1472, %v409_v49  }
  0x76   : > { %538 = vperm.xlu1 %1472, %v411_v50  }
  0xae   : > { %v440_v52 = vpop.xlane.xlu1 %439  ;;  %v436_v53 = vpop.xlane.xlu0 %435 }
  0xaf   : > { %v1830_v33 = vadd.f32 %v467_v29, %v440_v52  ;;  %v1836_v37 = vadd.f32 %v467_v29, %v436_v53 }
  0xb2   : > { %v442_v54 = vpop.xlane.xlu1 %441  ;;  %v438_v55 = vpop.xlane.xlu0 %437 }
  0xb3   : > { %v1834_v36 = vadd.f32 %v467_v29, %v442_v54  ;;  %v1838_v38 = vadd.f32 %v467_v29, %v438_v55 }
  0xb6   : > { %v446_v56 = vpop.xlane.xlu1 %445  ;;  %v444_v57 = vpop.xlane.xlu0 %443 }
  0xb7   : > { %v1842_v39 = vadd.f32 %v467_v29, %v446_v56  ;;  %v1846_v41 = vadd.f32 %v467_v29, %v444_v57 }
  0xba   : > { %v450_v58 = vpop.xlane.xlu1 %449  ;;  %v448_v59 = vpop.xlane.xlu0 %447 }
  0xbb   : > { %v1844_v40 = vadd.f32 %v467_v29, %v450_v58  ;;  %v1852_v43 = vadd.f32 %v467_v29, %v448_v59 }
  0xbe   : > { %v454_v60 = vpop.xlane.xlu1 %453  ;;  %v452_v61 = vpop.xlane.xlu0 %451 }
  0xbf   : > { %v1850_v42 = vadd.f32 %v467_v29, %v454_v60  ;;  %v1860_v45 = vadd.f32 %v467_v29, %v452_v61 }
  0xc2   : > { %v458_v62 = vpop.xlane.xlu1 %457  ;;  %v456_v63 = vpop.xlane.xlu0 %455 }
  0xc3   : > { %v1858_v44 = vadd.f32 %v467_v29, %v458_v62  ;;  %v1862_v46 = vadd.f32 %v467_v29, %v456_v63 }
  0xc6   : > { %v462_v0 = vpop.xlane.xlu1 %461  ;;  %v460_v1 = vpop.xlane.xlu0 %459 }
  0xc7   : > { %v1872_v50 = vadd.f32 %v467_v29, %v462_v0  ;;  %v1884_v53 = vadd.f32 %v467_v29, %v460_v1 }
  0xca   : > { %v466_v5 = vpop.xlane.xlu1 %465  ;;  %v464_v6 = vpop.xlane.xlu0 %463 }
  0xcb   : > { %v1882_v52 = vadd.f32 %v467_v29, %v466_v5  ;;  %v1921_v0 = vadd.f32 %v467_v29, %v464_v6 }
  0xce   : > { %v1806_v9 = vpop.permute.xlu1 %499 }
  0xcf   : > { %vm544_vm3 = vcmp.eq.s32.totalorder %v1809_v12, %v1806_v9 }
  0xd0   : > { %v560_v47 = vsel %vm544_vm3, %v1838_v38, -3.4028235e+38 }
  0xd1   : > { %v577_v56 = vsel %vm575_vm2, %v560_v47, -inf }
  0xd2   : > { %v1811_v13 = vpop.permute.xlu1 %502  ;;  %v497_v16 = vpop.permute.xlu0 %496 }
  0xd3   : > { %vm543_vm1 = vcmp.eq.s32.totalorder %v1809_v12, %v497_v16  ;;  %vm545_vm5 = vcmp.eq.s32.totalorder %v1809_v12, %v1811_v13 }
  0xd4   : > { %v1276_v17 = vsel %vm543_vm1, 1.0, %v2206_v35  ;;  %v561_v54 = vsel %vm545_vm5, %v1830_v33, -3.4028235e+38  ;;  %v559_v62 = vsel %vm543_vm1, %v1836_v37, -3.4028235e+38 }
  0xd5   : > { %1348 = vmatprep.mubr.msk.f32.mxu0 %vm575_vm2, %v1276_v17  ;;  %v578_v61 = vsel %vm575_vm2, %v561_v54, -inf  ;;  %v576_v54 = vsel %vm575_vm2, %v559_v62, -inf }
  0xd6   : > { %v1818_v20 = vpop.permute.xlu1 %505  ;;  %v1822_v24 = vpop.permute.xlu0 %523 }
  0xd7   : > { %vm546_vm7 = vcmp.eq.s32.totalorder %v1809_v12, %v1818_v20  ;;  %vm552_vm9 = vcmp.eq.s32.totalorder %v1809_v12, %v1822_v24 }
  0xd8   : > { %v562_v57 = vsel %vm546_vm7, %v1834_v36, -3.4028235e+38  ;;  %v568_v1 = vsel %vm552_vm9, %v1850_v42, -3.4028235e+38 }
  0xd9   : > { %v579_v6 = vsel %vm575_vm2, %v562_v57, -inf }
  0xda   : > { %v1820_v21 = vpop.permute.xlu1 %508  ;;  %v1828_v32 = vpop.permute.xlu0 %529 }
  0xdb   : > { %vm547_vm8 = vcmp.eq.s32.totalorder %v1809_v12, %v1820_v21  ;;  %vm554_vm12 = vcmp.eq.s32.totalorder %v1809_v12, %v1828_v32 }
  0xdc   : > { %v563_v58 = vsel %vm547_vm8, %v1846_v41, -3.4028235e+38  ;;  %v570_v47 = vsel %vm554_vm12, %v1858_v44, -3.4028235e+38 }
  0xdd   : > { %v580_v29 = vsel %vm575_vm2, %v563_v58, -inf }
  0xde   : > { %v1824_v25 = vpop.permute.xlu1 %511  ;;  %v1868_v48 = vpop.permute.xlu0 %535  ;;  %v581_v62 = vmax.f32 %v576_v54, %v580_v29 }
  0xdf   : > { %vm548_vm4 = vcmp.eq.s32.totalorder %v1809_v12, %v1824_v25  ;;  %vm556_vm14 = vcmp.eq.s32.totalorder %v1809_v12, %v1868_v48 }
  0xe0   : > { %v564_v51 = vsel %vm548_vm4, %v1842_v39, -3.4028235e+38 }
  0xe1   : > { %v582_v59 = vsel %vm575_vm2, %v564_v51, -inf }
  0xe2   : > { %v1826_v28 = vpop.permute.xlu1 %514  ;;  %v1931_v17 = vpop.permute.xlu0 %541  ;;  %v583_v51 = vmax.f32 %v577_v56, %v582_v59  ;;  %v590_v59 = vsel %vm575_vm2, %v568_v1, -inf }
  0xe3   : > { %vm549_vm10 = vcmp.eq.s32.totalorder %v1809_v12, %v1826_v28  ;;  %vm2216_vm15 = vcmp.eq.s32.totalorder %v1809_v12, %v1931_v17 }
  0xe4   : > { %v565_v5 = vsel %vm549_vm10, %v1852_v43, -3.4028235e+38  ;;  %v591_v8 = vmax.f32 %v583_v51, %v590_v59  ;;  %v574_v1 = vsel %vm2216_vm15, %v1882_v52, -3.4028235e+38 }
  0xe5   : > { %v584_v58 = vsel %vm575_vm2, %v565_v5, -inf  ;;  %v572_v5 = vsel %vm556_vm14, %v1872_v50, -3.4028235e+38 }
  0xe6   : > { %v1832_v34 = vpop.permute.xlu1 %517  ;;  %v585_v31 = vmax.f32 %v578_v61, %v584_v58  ;;  %v602_v61 = vsel %vm575_vm2, %v574_v1, -inf }
  0xe7   : > { %vm550_vm6 = vcmp.eq.s32.totalorder %v1809_v12, %v1832_v34 }
  0xe8   : > { %v566_v55 = vsel %vm550_vm6, %v1844_v40, -3.4028235e+38 }
  0xe9   : > { %v586_v63 = vsel %vm575_vm2, %v566_v55, -inf }
  0xea   : > { %v1870_v49 = vpop.permute.xlu1 %520  ;;  %v587_v55 = vmax.f32 %v579_v6, %v586_v63  ;;  %v594_v63 = vsel %vm575_vm2, %v570_v47, -inf }
  0xeb   : > { %vm551_vm11 = vcmp.eq.s32.totalorder %v1809_v12, %v1870_v49 }
  0xec   : > { %v567_v16 = vsel %vm551_vm11, %v1860_v45, -3.4028235e+38  ;;  %v595_v29 = vmax.f32 %v587_v55, %v594_v63 }
  0xed   : > { %v588_v56 = vsel %vm575_vm2, %v567_v16, -inf }
  0xee   : > { %v1912_v60 = vpop.permute.xlu1 %526  ;;  %v589_v47 = vmax.f32 %v581_v62, %v588_v56  ;;  %v603_v55 = vmax.f32 %v595_v29, %v602_v61  ;;  %v1998_v29 = vld [vmem:[%s1802_s16] sm:$0xff] }
  0xef   : > { %vm553_vm13 = vcmp.eq.s32.totalorder %v1809_v12, %v1912_v60 }
  0xf0   : > { %v569_v35 = vsel %vm553_vm13, %v1862_v46, -3.4028235e+38 }
  0xf1   : > { %v592_v16 = vsel %vm575_vm2, %v569_v35, -inf  ;;  %v598_v35 = vsel %vm575_vm2, %v572_v5, -inf }
  0xf2   : > { %v1950_v57 = vpop.permute.xlu1 %532  ;;  %v593_v51 = vmax.f32 %v585_v31, %v592_v16 }
  0xf3   : > { %vm2211_vm1 = vcmp.eq.s32.totalorder %v1809_v12, %v1950_v57 }
  0xf4   : > { %v571_v6 = vsel %vm2211_vm1, %v1884_v53, -3.4028235e+38 }
  0xf5   : > { %v596_v30 = vsel %vm575_vm2, %v571_v6, -inf  ;;  %v599_v6 = vmax.f32 %v591_v8, %v598_v35 }
  0xf6   : > { %v539_v54 = vpop.permute.xlu1 %538  ;;  %v597_v59 = vmax.f32 %v589_v47, %v596_v30  ;;  %v2225_v47 = vlaneseq }
  0xf7   : > { %vm557_vm1 = vcmp.eq.s32.totalorder %v1809_v12, %v539_v54 }
  0xf8   : > { %v573_v27 = vsel %vm557_vm1, %v1921_v0, -3.4028235e+38  ;;  %v604_v56 = vmax.f32 %v597_v59, %v599_v6  ;;  %v1982_v23 = vshrl.u32 %v2225_v47, 7 }
  0xf9   : > { %v600_v58 = vsel %vm575_vm2, %v573_v27, -inf }
  0xfa   : > { %v601_v26 = vmax.f32 %v593_v51, %v600_v58  ;;  %vm613_vm15 = vcmp.eq.s32.totalorder %v1982_v23, %v1809_v12 }
  0xfc   : > { %v605_v62 = vmax.f32 %v601_v26, %v603_v55  ;;  %v2226_v26 = vmov 0.0  }
  0xfd   : > { %376 = vst.msk [vmem:[%s1992_s20] sm:$0xff] %vm375_vm0, %v2226_v26  ;;  %v1277_v35 = vsel %vm544_vm3, 1.0, %v2226_v26  ;;  %v1278_v61 = vsel %vm545_vm5, 1.0, %v2226_v26  ;;  %v1279_v58 = vsel %vm546_vm7, 1.0, %v2226_v26  ;;  %v1280_v9 = vsel %vm547_vm8, 1.0, %v2226_v26 }
  0xfe   : > { %v606_v63 = vmax.f32 %v604_v56, %v605_v62  ;;  %v1281_v13 = vsel %vm548_vm4, 1.0, %v2226_v26  ;;  %v1282_v20 = vsel %vm549_vm10, 1.0, %v2226_v26  ;;  %v1283_v21 = vsel %vm550_vm6, 1.0, %v2226_v26 }
  0xff   : > { %v1284_v25 = vsel %vm551_vm11, 1.0, %v2226_v26  ;;  %v1285_v28 = vsel %vm552_vm9, 1.0, %v2226_v26  ;;  %v1286_v34 = vsel %vm553_vm13, 1.0, %v2226_v26  ;;  %v1287_v49 = vsel %vm554_vm12, 1.0, %v2226_v26 }
 0x100   : > { %v607_v31 = vrot.slane %v606_v63, 4  ;;  %vm2227_vm3 = vcmp.eq.s32.totalorder %v1809_v12, %v1950_v57  ;;  %v1289_v60 = vsel %vm556_vm14, 1.0, %v2226_v26  ;;  %v1290_v6 = vsel %vm557_vm1, 1.0, %v2226_v26 }
 0x101   : > { %v1288_v24 = vsel %vm2227_vm3, 1.0, %v2226_v26  ;;  %vm2228_vm4 = vcmp.eq.s32.totalorder %v1809_v12, %v1931_v17 }
 0x102   : > { %v608_v30 = vmax.f32 %v606_v63, %v607_v31  ;;  %v1291_v32 = vsel %vm2228_vm4, 1.0, %v2226_v26 }
 0x104   : > { %v609_v16 = vrot.slane %v608_v30, 2 }
 0x106   : > { %v610_v5 = vmax.f32 %v608_v30, %v609_v16 }
 0x108   : > { %v611_v22 = vrot.slane %v610_v5, 1 }
 0x10a   : > { %v612_v27 = vmax.f32 %v610_v5, %v611_v22 }
 0x10c   : > { %v614_v8 = vsel %vm613_vm15, %v612_v27, 0.0 }
 0x10d   : > { %v615_v1 = vsel %vm575_vm2, %v614_v8, 0.0 }
 0x10e   : > { %616 = vadd.xlane.f32.xlu1 %v615_v1 }
 0x19b   : > { %v617_v51 = vpop.xlane.xlu1 %616 }
 0x19c   : > { %v2001_v59 = vmax.f32 %v1998_v29, %v617_v51 }
 0x19e   : > { %v620_v22 = vsub.f32 %v1998_v29, %v2001_v59  ;;  %1096 = vst.msk [vmem:[%s1802_s16] sm:$0xff] %vm375_vm0, %v2001_v59  ;;  %1346 = vmatprep.subr.mxu0 %v2001_v59 }
 0x19f   : > { %1347 = vmatpush3.msra.mxu0 %v2001_v59 }
 0x1a0   : > { %1349 = vmatmul.mubr.msk.f32.vlgmr.msra.gmra.mrb[0].mxu0 %vm575_vm2, %v1277_v35 }
 0x1a1   : > { %1351 = vmatprep.mubr.msk.f32.mxu0 %vm575_vm2, %v1278_v61 }
 0x1a4   : > { %1352 = vmatmul.mubr.msk.f32.gmra.mrb[2].mxu0 %vm575_vm2, %v1279_v58 }
 0x1a5   : > { %1354 = vmatprep.mubr.msk.f32.mxu0 %vm575_vm2, %v1280_v9 }
 0x1a8   : > { %1355 = vmatmul.mubr.msk.f32.gmra.mrb[4].mxu0 %vm575_vm2, %v1281_v13 }
 0x1a9   : > { %1357 = vmatprep.mubr.msk.f32.mxu0 %vm575_vm2, %v1282_v20 }
 0x1ac   : > { %1358 = vmatmul.mubr.msk.f32.gmra.mrb[6].mxu0 %vm575_vm2, %v1283_v21 }
 0x1ad   : > { %1360 = vmatprep.mubr.msk.f32.mxu0 %vm575_vm2, %v1284_v25 }
 0x1b0   : > { %1361 = vmatmul.mubr.msk.f32.gmra.mrb[8].mxu0 %vm575_vm2, %v1285_v28 }
 0x1b1   : > { %1363 = vmatprep.mubr.msk.f32.mxu0 %vm575_vm2, %v1286_v34 }
 0x1b4   : > { %1364 = vmatmul.mubr.msk.f32.gmra.mrb[10].mxu0 %vm575_vm2, %v1287_v49 }
 0x1b5   : > { %1366 = vmatprep.mubr.msk.f32.mxu0 %vm575_vm2, %v1288_v24 }
 0x1b8   : > { %1367 = vmatmul.mubr.msk.f32.gmra.mrb[12].mxu0 %vm575_vm2, %v1289_v60 }
 0x1b9   : > { %1369 = vmatprep.mubr.msk.f32.mxu0 %vm575_vm2, %v1290_v6 }
 0x1bc   : > { %1370 = vmatmul.mubr.msk.f32.gmra.mrb[14].mxu0 %vm575_vm2, %v1291_v32  ;;  %vm992_vm2 = vcmp.eq.s32.totalorder %v1809_v12, 0 }
 0x1bd   : > { %vm2107_vm5 = vmpackc.low %vm992_vm2, %vm992_vm2 }
 0x273   : > { %v1350_v57 = vpop.f32.mrb[0].mxu0 }
 0x274   : > { %v849_v55 = vsub.f32 %v1838_v38, %v1350_v57  ;;  %v769_v48 = vpop.f32.mrb[1].mxu0 }
 0x275   : > { %v848_v56 = vsub.f32 %v1836_v37, %v769_v48 }
 0x276   : > { %v866_v62 = vmul.f32 1.442695, %v849_v55 }
 0x277   : > { %v1353_v54 = vpop.f32.mrb[2].mxu0  ;;  %v864_v63 = vmul.f32 1.442695, %v848_v56 }
 0x278   : > { %1473 = vpow2.f32 %v866_v62  ;;  %v851_v31 = vsub.f32 %v1834_v36, %v1353_v54  ;;  %v779_v30 = vpop.f32.mrb[3].mxu0 }
 0x279   : > { %1475 = vpow2.f32 %v864_v63  ;;  %v850_v17 = vsub.f32 %v1830_v33, %v779_v30 }
 0x27a   : > { %v870_v47 = vmul.f32 1.442695, %v851_v31 }
 0x27b   : > { %v1356_v16 = vpop.f32.mrb[4].mxu0  ;;  %v868_v38 = vmul.f32 1.442695, %v850_v17 }
 0x27c   : > { %v789_v5 = vpop.f32.mrb[5].mxu0  ;;  %v853_v27 = vsub.f32 %v1842_v39, %v1356_v16  ;;  %1477 = vpow2.f32 %v870_v47 }
 0x27d   : > { %1479 = vpow2.f32 %v868_v38  ;;  %v852_v36 = vsub.f32 %v1846_v41, %v789_v5 }
 0x27e   : > { %v874_v26 = vmul.f32 1.442695, %v853_v27 }
 0x27f   : > { %v1359_v8 = vpop.f32.mrb[6].mxu0  ;;  %v872_v39 = vmul.f32 1.442695, %v852_v36 }
 0x280   : > { %v799_v1 = vpop.f32.mrb[7].mxu0  ;;  %1481 = vpow2.f32 %v874_v26  ;;  %v855_v13 = vsub.f32 %v1844_v40, %v1359_v8 }
 0x281   : > { %v854_v41 = vsub.f32 %v1852_v43, %v799_v1 }
 0x282   : > { %v1474_v37 = vpop.eup %1473  ;;  %v878_v28 = vmul.f32 1.442695, %v855_v13 }
 0x283   : > { %903 = vperm.xlu0 %1471, %v1474_v37   ;;  %v1362_v51 = vpop.f32.mrb[8].mxu0  ;;  %v1476_v58 = vpop.eup %1475  ;;  %v876_v24 = vmul.f32 1.442695, %v854_v41 }
 0x284   : > { %v857_v35 = vsub.f32 %v1850_v42, %v1362_v51  ;;  %v809_v61 = vpop.f32.mrb[9].mxu0 }
 0x285   : > { %v856_v60 = vsub.f32 %v1860_v45, %v809_v61 }
 0x286   : > { %v882_v9 = vmul.f32 1.442695, %v857_v35  ;;  %v1478_v21 = vpop.eup %1477 }
 0x287   : > { %898 = vperm.xlu0 %1471, %v1476_v58   ;;  %v1365_v33 = vpop.f32.mrb[10].mxu0  ;;  %v1480_v42 = vpop.eup %1479  ;;  %v880_v48 = vmul.f32 1.442695, %v856_v60 }
 0x288   : > { %1483 = vpow2.f32 %v882_v9  ;;  %v819_v20 = vpop.f32.mrb[11].mxu0  ;;  %v859_v43 = vsub.f32 %v1858_v44, %v1365_v33 }
 0x289   : > { %1485 = vpow2.f32 %v872_v39  ;;  %v858_v54 = vsub.f32 %v1862_v46, %v819_v20 }
 0x28a   : > { %1487 = vpow2.f32 %v878_v28  ;;  %v1482_v32 = vpop.eup %1481  ;;  %v886_v62 = vmul.f32 1.442695, %v859_v43  ;;  %v2233_v43 = vld [vmem:[#allocation8_spill] sm:$0xff] }
 0x28b   : > { %913 = vperm.xlu0 %1471, %v1478_v21   ;;  %v1368_v25 = vpop.f32.mrb[12].mxu0  ;;  %1489 = vpow2.f32 %v876_v24  ;;  %v884_v63 = vmul.f32 1.442695, %v858_v54 }
 0x28c   : > { %v829_v34 = vpop.f32.mrb[13].mxu0 }
 0x28d   : > { %v860_v44 = vsub.f32 %v1884_v53, %v829_v34 }
 0x28f   : > { %908 = vperm.xlu0 %1471, %v1480_v42   ;;  %v1371_v49 = vpop.f32.mrb[14].mxu0  ;;  %v888_v17 = vmul.f32 1.442695, %v860_v44  ;;  %v2236_v44 = vld [vmem:[#allocation10_spill] sm:$0xff] }
 0x290   : > { %v839_v6 = vpop.f32.mrb[15].mxu0  ;;  %v863_v46 = vsub.f32 %v1882_v52, %v1371_v49 }
 0x291   : > { %v862_v40 = vsub.f32 %v1921_v0, %v839_v6  ;;  %v861_v0 = vsub.f32 %v1872_v50, %v1368_v25  ;;  %v621_v50 = vmul.f32 1.442695, %v620_v22  ;;  %v2231_v6 = vld [vmem:[#allocation6_spill] sm:$0xff] }
 0x292   : > { %v1484_v57 = vpop.eup %1483  ;;  %v894_v27 = vmul.f32 1.442695, %v863_v46  ;;  %v1274_v46 = vld [vmem:[%s352_s23] ss:$0 sm:$0xff]  ;;  %s1513_s23 = scalar_lea.vmem %s1512_s22, 256 }
 0x293   : > { %v892_v55 = vmul.f32 1.442695, %v862_v40  ;;  %923 = vperm.xlu0 %1471, %v1482_v32   ;;  %943 = vperm.xlu1 %1472, %v1484_v57   ;;  %v1486_v56 = vpop.eup %1485  ;;  %v890_v16 = vmul.f32 1.442695, %v861_v0  ;;  %v2232_v40 = vld [vmem:[#allocation7_spill] sm:$0xff]  ;;  %vm490_vm6 = vcmp.eq.s32.totalorder %v1982_v23, %v1274_v46  ;;  %p1515_p3 = scmp.lt.s32.totalorder %s1513_s23, %s1507_s19 }
 0x294   : > { %v1488_v45 = vpop.eup %1487 }
 0x295   : > { %1491 = vpow2.f32 %v892_v55  ;;  %v1490_v31 = vpop.eup %1489  ;;  %p1516_p5 = por %p1515_p3, %p1514_p2 }
 0x296   : > { %1493 = vpow2.f32 %v880_v48 }
 0x297   : > { %918 = vperm.xlu0 %1471, %v1486_v56   ;;  %1495 = vpow2.f32 %v886_v62  ;;  %v2234_v62 = vld [vmem:[#allocation9_spill] sm:$0xff]  ;;  %p1517_p6 = pnand %p1516_p5, %p1510_p1 }
 0x298   : > { %1497 = vpow2.f32 %v884_v63 }
 0x299   : > { %1499 = vpow2.f32 %v890_v16 }
 0x29a   : > { %1501 = vpow2.f32 %v888_v17 }
 0x29b   : > { %933 = vperm.xlu0 %1471, %v1488_v45   ;;  %1503 = vpow2.f32 %v894_v27  ;;  %v1590_v27 = vmov 1.0  }
 0x29c   : > { %1505 = vpow2.f32 %v621_v50 }
 0x29f   : > { %v1492_v30 = vpop.eup %1491  ;;  %928 = vperm.xlu0 %1471, %v1490_v31  }
 0x2a0   : > { %968 = vperm.xlu1 %1472, %v1492_v30   ;;  %v1494_v47 = vpop.eup %1493  ;;  %v2235_v30 = vld [vmem:[#allocation11_spill] sm:$0xff] }
 0x2a1   : > { %v1496_v5 = vpop.eup %1495 }
 0x2a2   : > { %v1498_v8 = vpop.eup %1497 }
 0x2a3   : > { %938 = vperm.xlu0 %1471, %v1494_v47   ;;  %v1500_v38 = vpop.eup %1499 }
 0x2a4   : > { %v1502_v53 = vpop.eup %1501 }
 0x2a5   : > { %v1504_v1 = vpop.eup %1503 }
 0x2a6   : > { %v2103_v37 = vpop.eup %1505 }
 0x2a7   : > { %953 = vperm.xlu0 %1471, %v1496_v5  }
 0x2ab   : > { %948 = vperm.xlu0 %1471, %v1498_v8  }
 0x2af   : > { %963 = vperm.xlu0 %1471, %v1500_v38  }
 0x2b3   : > { %958 = vperm.xlu0 %1471, %v1502_v53  }
 0x2b7   : > { %973 = vperm.xlu0 %1471, %v1504_v1  }
 0x2bb   : > { %1090 = vperm.xlu0 %1471, %v2103_v37  }
 0x302   : > { %v904_v52 = vpop.permute.xlu0 %903 }
 0x303   : > { %v977_v29 = vmul.f32 %v904_v52, %v1716_v7 }
 0x306   : > { %v899_v26 = vpop.permute.xlu0 %898 }
 0x307   : > { %v976_v59 = vmul.f32 %v899_v26, %v1708_v3  ;;  %v1372_v22 = vpack.c.bf16 %v904_v52, %v899_v26 }
 0x309   : > { %1374 = vmatprep.subr.msk.bf16.mxu1 %vm2107_vm5, %v1372_v22  ;;  %v1375_v36 = vpack.c.bf16 %v977_v29, %v976_v59 }
 0x30a   : > { %v914_v35 = vpop.permute.xlu0 %913 }
 0x30b   : > { %1376 = vmatpush1.bf16.msra.mxu1 %v1375_v36  ;;  %v979_v58 = vmul.f32 %v914_v35, %v1711_v4 }
 0x30e   : > { %v909_v61 = vpop.permute.xlu0 %908 }
 0x30f   : > { %v978_v12 = vmul.f32 %v909_v61, %v1705_v2  ;;  %v1377_v9 = vpack.c.bf16 %v914_v35, %v909_v61 }
 0x311   : > { %v1380_v33 = vpack.c.bf16 %v979_v58, %v978_v12  ;;  %1379 = vmatprep.subr.msk.bf16.mxu1 %vm2107_vm5, %v1377_v9 }
 0x312   : > { %v924_v7 = vpop.permute.xlu0 %923  ;;  %v944_v34 = vpop.permute.xlu1 %943 }
 0x313   : > { %1381 = vmatpush1.bf16.msra.mxu1 %v1380_v33  ;;  %v981_v39 = vmul.f32 %v924_v7, %v1721_v10 }
 0x316   : > { %v919_v3 = vpop.permute.xlu0 %918 }
 0x317   : > { %v980_v13 = vmul.f32 %v919_v3, %v1724_v11  ;;  %v1382_v20 = vpack.c.bf16 %v924_v7, %v919_v3  ;;  %v985_v11 = vmul.f32 %v944_v34, %v1737_v18 }
 0x319   : > { %v1385_v21 = vpack.c.bf16 %v981_v39, %v980_v13  ;;  %1384 = vmatprep.subr.msk.bf16.mxu1 %vm2107_vm5, %v1382_v20 }
 0x31a   : > { %v934_v4 = vpop.permute.xlu0 %933 }
 0x31b   : > { %1386 = vmatpush1.bf16.msra.mxu1 %v1385_v21  ;;  %v983_v25 = vmul.f32 %v934_v4, %v1729_v14 }
 0x31e   : > { %v929_v2 = vpop.permute.xlu0 %928 }
 0x31f   : > { %v982_v28 = vmul.f32 %v929_v2, %v1732_v15  ;;  %v1387_v41 = vpack.c.bf16 %v934_v4, %v929_v2  ;;  %v969_v63 = vpop.permute.xlu1 %968 }
 0x320   : > { %v990_v16 = vmul.f32 %v969_v63, %v2235_v30 }
 0x321   : > { %v1390_v42 = vpack.c.bf16 %v983_v25, %v982_v28  ;;  %1389 = vmatprep.subr.msk.bf16.mxu1 %vm2107_vm5, %v1387_v41 }
 0x322   : > { %v939_v10 = vpop.permute.xlu0 %938 }
 0x323   : > { %v984_v49 = vmul.f32 %v939_v10, %v1740_v19  ;;  %v1392_v24 = vpack.c.bf16 %v944_v34, %v939_v10  ;;  %1391 = vmatpush1.bf16.msra.mxu1 %v1390_v42 }
 0x325   : > { %v1395_v60 = vpack.c.bf16 %v985_v11, %v984_v49  ;;  %1394 = vmatprep.subr.msk.bf16.mxu1 %vm2107_vm5, %v1392_v24 }
 0x326   : > { %v954_v14 = vpop.permute.xlu0 %953 }
 0x327   : > { %1396 = vmatpush1.bf16.msra.mxu1 %v1395_v60  ;;  %v987_v32 = vmul.f32 %v954_v14, %v2231_v6 }
 0x32a   : > { %v949_v15 = vpop.permute.xlu0 %948 }
 0x32b   : > { %v986_v57 = vmul.f32 %v949_v15, %v2232_v40  ;;  %v1397_v55 = vpack.c.bf16 %v954_v14, %v949_v15 }
 0x32d   : > { %v1400_v48 = vpack.c.bf16 %v987_v32, %v986_v57  ;;  %1399 = vmatprep.subr.msk.bf16.mxu1 %vm2107_vm5, %v1397_v55 }
 0x32e   : > { %v964_v18 = vpop.permute.xlu0 %963 }
 0x32f   : > { %1401 = vmatpush1.bf16.msra.mxu1 %v1400_v48  ;;  %v989_v56 = vmul.f32 %v964_v18, %v2233_v43 }
 0x332   : > { %v959_v19 = vpop.permute.xlu0 %958 }
 0x333   : > { %v988_v54 = vmul.f32 %v959_v19, %v2234_v62  ;;  %v1402_v45 = vpack.c.bf16 %v964_v18, %v959_v19 }
 0x335   : > { %v1405_v0 = vpack.c.bf16 %v989_v56, %v988_v54  ;;  %1404 = vmatprep.subr.msk.bf16.mxu1 %vm2107_vm5, %v1402_v45 }
 0x336   : > { %v974_v31 = vpop.permute.xlu0 %973 }
 0x337   : > { %v991_v47 = vmul.f32 %v974_v31, %v2236_v44  ;;  %v1407_v17 = vpack.c.bf16 %v974_v31, %v969_v63  ;;  %1406 = vmatpush1.bf16.msra.mxu1 %v1405_v0 }
 0x339   : > { %v1410_v5 = vpack.c.bf16 %v991_v47, %v990_v16  ;;  %1409 = vmatprep.subr.msk.bf16.mxu1 %vm2107_vm5, %v1407_v17 }
 0x33a   : > { %v1091_v8 = vpop.permute.xlu0 %1090 }
 0x33b   : > { %1411 = vmatpush1.bf16.msra.mxu1 %v1410_v5  ;;  %v1093_v50 = vmul.f32 0.0, %v1091_v8 }
 0x33e   : > { %1324 = vmatmul.mubr.msk.f32.vlgmr.msra.gmra.mrb[0].mxu1 %vm490_vm6, %v1590_v27 }
 0x411   : > { %v1075_v38 = vpop.f32.mrb[0].mxu1 }
 0x412   : > { %v1094_v53 = vadd.f32 %v1093_v50, %v1075_v38  ;;  %v1077_v1 = vpop.f32.mrb[1].mxu1 }
 0x413   : > { %1082 = vadd.xlane.f32.xlu1 %v1077_v1 }
 0x414   : > { %1095 = vst [vmem:[%s328_s2] sm:$0xff] %v1094_v53 }
 0x415   : > { %1520 = shalt.err (!%p1517_p6)
}
 0x416   : > { %s1521_s29 = scalar_lea.hbm %s2153_s17, 128  ;;  %s1525_s2 = scalar_lea.hbm %s2203_s5, 256 }
 0x417   : > { %p1522_p7 = scmp.ne.s32.totalorder %s2153_s17, %s1521_s29  ;;  %p1526_p11 = scmp.lt.u32.totalorder %s2153_s17, %s2203_s5 }
 0x418   : > { %p1527_p12 = scmp.lt.u32.totalorder %s1525_s2, %s1521_s29  ;;  %p1529_p0 = scmp.lt.u32.totalorder %s1521_s29, %s2153_s17 }
 0x419   : > { %p1523_p9 = pnand %p1522_p7, %p1675_p4 }
 0x41a   : > { %p1528_p13 = por %p1527_p12, %p1526_p11 }
 0x41b   : > { %p1524_p10 = pneg %p1523_p9 }
 0x41c   : > { %p1530_p1 = por %p1529_p0, %p1528_p13 }
 0x41e   : > { %p1531_p2 = pnand %p1530_p1, %p1524_p10 }
 0x420   : > { %1534 = shalt.err (!%p1531_p2)
}
 0x421   : > { %1412 = dma.vmem_to_hbm [thread:$0]  (%p1675_p4), %s1120_s11, 128, %s2153_s17, %s1098_s18   ;;  %v1080_v23 = vld [vmem:[%s1992_s20] sm:$0xff] }
 0x422   : > { %v1081_v52 = vmul.f32 %v2103_v37, %v1080_v23 }
 0x4a0   : > { %v1083_v26 = vpop.xlane.xlu1 %1082 }
 0x4a1   : > { %v1084_v51 = vadd.f32 %v1083_v26, %v1081_v52 }
 0x4a3   : > { %1086 = vst.msk [vmem:[%s1992_s20] sm:$0xff] %vm375_vm0, %v1084_v51 }
 0x4a4 PF: > { %p1418_p3 = scmp.ge.s32.totalorder %s1585_s8, 2  ;;  %s1137_s16 = sand.u32 1, %s1565_s26  }
 0x4a5   : > { %s1138_s12 = scalar_lea.sflag [#allocation4], %s1137_s16 }
 0x4a6   : > { %p1415_p5 = pnand %p1418_p3, %p1682_p8 }
 0x4a8   : > { %1560 = dma.done.wait (!%p1415_p5), %s1138_s12, 128  }
 0x4a9   : > { %1562 = vsyncadd (!%p1415_p5), %s1138_s12, 4294967168  ;;  %s22_s8 = sadd.s32 1, %s1585_s8   ;;  %s2237_s26 = smov %s1569_s27 }
 0x4aa   : > { %p19_p4 = scmp.ge.s32.totalorder %s22_s8, 4   ;;  %s2238_s27 = smov %s1573_s28 }
 0x4ab   : > { %s2239_s28 = smov %s1688_s15  ;;  %s2240_s29 = smov %s1581_s30 }
 0x4ac   : > { %s2241_s30 = smov %s2243_s10  ;;  %21 = sbr.rel (!%p19_p4) target bundleno = 6 (0x6), region = 109 }
 0x4b3   :  { %1157 = vsyncpa [#allocation4], 1 }
 0x4b4   :  { %1159 = vsyncpa [#allocation4 + $0x1], 1 }

</bundles_post_ra>
